<compile_context>
chip_gen: v7x
topology: tpu7x:2x2x1
jax: 0.10.0
libtpu: 0.0.40
codegen_flags: <defaults>
</compile_context>

<pallas_src>
import functools
import math

import jax
import jax.numpy as jnp
from jax.experimental import pallas as pl
from jax.experimental.pallas import tpu as pltpu

_VMEM_LIMIT = 48 * 1024 * 1024  # safe on v5e/v6e (128 MiB) and v7x (64 MiB phys)


def _pick_tile(dim, want, align):
    """Largest tile <= `want` that divides `dim` and is `align`-aligned (or full dim)."""
    if dim <= want:
        return dim
    for t in range(want, 0, -1):
        if dim % t == 0 and t % align == 0:
            return t
    return dim


# ---------------------------------------------------------------------------
# Fused (optional LayerNorm) -> matmul -> bias -> (optional relu / residual)
# ---------------------------------------------------------------------------
def _make_linear_kernel(*, do_ln, relu, has_residual, eps):
    def kernel(*refs):
        i = 0
        x_ref = refs[i]; i += 1
        if do_ln:
            alpha_ref, beta_ref = refs[i], refs[i + 1]; i += 2
        w_ref, b_ref = refs[i], refs[i + 1]; i += 2
        if has_residual:
            r_ref = refs[i]; i += 1
        o_ref = refs[i]

        x = x_ref[...].astype(jnp.float32)
        if do_ln:
            d = x.shape[-1]
            mean = jnp.mean(x, axis=-1, keepdims=True)
            centered = x - mean
            # torch.std: UNBIASED (divide by d-1); divide by (std + eps).
            var_unbiased = jnp.sum(centered * centered, axis=-1, keepdims=True) * (
                1.0 / (d - 1))
            std = jnp.sqrt(var_unbiased)
            inv = pl.reciprocal(std + eps, approx=True)  # EUP, frees VALU slots
            x = (alpha_ref[...].astype(jnp.float32) * (centered * inv)
                 + beta_ref[...].astype(jnp.float32))

        # bf16 operands on the MXU, f32 accumulation.
        y = jnp.dot(x.astype(jnp.bfloat16), w_ref[...].astype(jnp.bfloat16),
                    preferred_element_type=jnp.float32)
        y = y + b_ref[...].astype(jnp.float32)
        if relu:
            y = jnp.maximum(y, 0.0)
        if has_residual:
            y = y + r_ref[...].astype(jnp.float32)
        o_ref[...] = y.astype(o_ref.dtype)

    return kernel


def fused_linear(x, w, b, *, alpha=None, beta=None, residual=None, relu=False,
                 eps=1e-6, out_dtype=jnp.float32, tile_m=256, tile_n=512):
    """out = [residual +] act( LN?(x) @ w + b ).  x:(M,K)  w:(K,N)  b:(N,)."""
    M, K = x.shape
    Kw, N = w.shape
    assert Kw == K
    tm = _pick_tile(M, tile_m, 8)
    tn = _pick_tile(N, tile_n, 128)
    grid = (M // tm, N // tn)

    do_ln = alpha is not None
    has_res = residual is not None

    in_specs = [pl.BlockSpec((tm, K), lambda i, j: (i, 0))]
    args = [x]
    if do_ln:
        in_specs += [pl.BlockSpec((1, K), lambda i, j: (0, 0)),
                     pl.BlockSpec((1, K), lambda i, j: (0, 0))]
        args += [alpha.reshape(1, K).astype(jnp.float32),
                 beta.reshape(1, K).astype(jnp.float32)]
    in_specs += [pl.BlockSpec((K, tn), lambda i, j: (0, j)),
                 pl.BlockSpec((1, tn), lambda i, j: (0, j))]
    args += [w.astype(jnp.bfloat16), b.reshape(1, N).astype(jnp.float32)]
    if has_res:
        in_specs.append(pl.BlockSpec((tm, tn), lambda i, j: (i, j)))
        args.append(residual)

    kernel = _make_linear_kernel(do_ln=do_ln, relu=relu,
                                 has_residual=has_res, eps=eps)

    return pl.pallas_call(
        kernel,
        out_shape=jax.ShapeDtypeStruct((M, N), out_dtype),
        grid=grid,
        in_specs=in_specs,
        out_specs=pl.BlockSpec((tm, tn), lambda i, j: (i, j)),
        compiler_params=pltpu.CompilerParams(
            dimension_semantics=("parallel", "parallel"),
            vmem_limit_bytes=_VMEM_LIMIT),
    )(*args)


# ---------------------------------------------------------------------------
# Scaled dot-product attention, one (batch, head) pair per grid step
# ---------------------------------------------------------------------------
def _attention_kernel(q_ref, k_ref, v_ref, mask_ref, o_ref, *, scale):
    q = q_ref[0].astype(jnp.bfloat16)        # (Sq, dk)
    k = k_ref[0].astype(jnp.bfloat16)        # (Sk, dk)
    v = v_ref[0].astype(jnp.bfloat16)        # (Sk, dk)

    scores = jax.lax.dot_general(             # q @ k.T  (contract last dims)
        q, k, (((1,), (1,)), ((), ())),
        preferred_element_type=jnp.float32) * scale
    scores = jnp.where(mask_ref[0] == 0, -1e9, scores)

    m = jnp.max(scores, axis=-1, keepdims=True)
    p = jnp.exp(scores - m)
    denom = jnp.sum(p, axis=-1, keepdims=True)
    p = p * pl.reciprocal(denom, approx=True)

    out = jnp.dot(p.astype(jnp.bfloat16), v, preferred_element_type=jnp.float32)
    o_ref[0] = out.astype(o_ref.dtype)


def multi_head_attention(q2d, k2d, v2d, mask, *, batch, seq_q, seq_k, n_heads):
    """q2d:(B*Sq,D) k2d,v2d:(B*Sk,D) mask:(B,Sq,Sk) int -> (B*Sq, D) bf16."""
    D = q2d.shape[-1]
    d_k = D // n_heads

    def to_heads(t2d, seq):
        return (t2d.reshape(batch, seq, n_heads, d_k)
                .transpose(0, 2, 1, 3)
                .reshape(batch * n_heads, seq, d_k))

    qh = to_heads(q2d, seq_q)
    kh = to_heads(k2d, seq_k)
    vh = to_heads(v2d, seq_k)

    kernel = functools.partial(_attention_kernel, scale=1.0 / math.sqrt(d_k))
    out = pl.pallas_call(
        kernel,
        out_shape=jax.ShapeDtypeStruct((batch * n_heads, seq_q, d_k), jnp.bfloat16),
        grid=(batch * n_heads,),
        in_specs=[
            pl.BlockSpec((1, seq_q, d_k), lambda i: (i, 0, 0)),
            pl.BlockSpec((1, seq_k, d_k), lambda i: (i, 0, 0)),
            pl.BlockSpec((1, seq_k, d_k), lambda i: (i, 0, 0)),
            pl.BlockSpec((1, seq_q, seq_k), lambda i: (i // n_heads, 0, 0)),
        ],
        out_specs=pl.BlockSpec((1, seq_q, d_k), lambda i: (i, 0, 0)),
        compiler_params=pltpu.CompilerParams(
            dimension_semantics=("parallel",),
            vmem_limit_bytes=_VMEM_LIMIT),
    )(qh, kh, vh, mask)

    return (out.reshape(batch, n_heads, seq_q, d_k)
            .transpose(0, 2, 1, 3)
            .reshape(batch * seq_q, D))


# ---------------------------------------------------------------------------
# DecoderBlock forward
# ---------------------------------------------------------------------------
def decoder_block_forward(x, enc_output, src_mask, tgt_mask, params, *,
                          n_heads, eps=1e-6):
    B, S, D = x.shape
    _, S_enc, _ = enc_output.shape
    tokens = B * S
    x2 = x.reshape(tokens, D).astype(jnp.float32)
    enc2 = enc_output.reshape(B * S_enc, D).astype(jnp.float32)
    zeros_d = jnp.zeros((D,), jnp.float32)

    # ---- residual connection 1: self-attention (pre-LN, fused QKV proj) ----
    w_qkv = jnp.concatenate(
        [params["self_wq"], params["self_wk"], params["self_wv"]], axis=1)
    qkv = fused_linear(x2, w_qkv, jnp.zeros((3 * D,), jnp.float32),
                       alpha=params["ln1_alpha"], beta=params["ln1_beta"],
                       eps=eps, out_dtype=jnp.bfloat16)
    q, k, v = jnp.split(qkv, 3, axis=1)
    attn = multi_head_attention(q, k, v, tgt_mask,
                                batch=B, seq_q=S, seq_k=S, n_heads=n_heads)
    x2 = fused_linear(attn, params["self_wo"], zeros_d,
                      residual=x2, out_dtype=jnp.float32)

    # ---- residual connection 2: cross-attention (pre-LN on q only) ----
    q = fused_linear(x2, params["cross_wq"], zeros_d,
                     alpha=params["ln2_alpha"], beta=params["ln2_beta"],
                     eps=eps, out_dtype=jnp.bfloat16)
    w_kv = jnp.concatenate([params["cross_wk"], params["cross_wv"]], axis=1)
    kv = fused_linear(enc2, w_kv, jnp.zeros((2 * D,), jnp.float32),
                      out_dtype=jnp.bfloat16)
    k, v = jnp.split(kv, 2, axis=1)
    attn = multi_head_attention(q, k, v, src_mask,
                                batch=B, seq_q=S, seq_k=S_enc, n_heads=n_heads)
    x2 = fused_linear(attn, params["cross_wo"], zeros_d,
                      residual=x2, out_dtype=jnp.float32)

    # ---- residual connection 3: feed-forward ----
    h = fused_linear(x2, params["ffn_w1"], params["ffn_b1"],
                     alpha=params["ln3_alpha"], beta=params["ln3_beta"],
                     eps=eps, relu=True, out_dtype=jnp.bfloat16)
    x2 = fused_linear(h, params["ffn_w2"], params["ffn_b2"],
                      residual=x2, out_dtype=jnp.float32)

    return x2.reshape(B, S, D)


# ---------------------------------------------------------------------------
# Pure-JAX f32 reference (mirrors the PyTorch forward, eval-mode dropout)
# ---------------------------------------------------------------------------
def _ref_layernorm(x, alpha, beta, eps):
    mean = jnp.mean(x, axis=-1, keepdims=True)
    var = jnp.sum((x - mean) ** 2, axis=-1, keepdims=True) / (x.shape[-1] - 1)
    std = jnp.sqrt(var)
    return alpha * (x - mean) / (std + eps) + beta


def _ref_mha(q, k, v, mask, wq, wk, wv, wo, n_heads):
    B, Sq, D = q.shape
    Sk = k.shape[1]
    d_k = D // n_heads

    def heads(t, s):
        return t.reshape(B, s, n_heads, d_k).transpose(0, 2, 1, 3)

    Q, K, V = heads(q @ wq, Sq), heads(k @ wk, Sk), heads(v @ wv, Sk)
    scores = jnp.einsum("bhqd,bhkd->bhqk", Q, K) / math.sqrt(d_k)
    scores = jnp.where(mask[:, None, :, :] == 0, -1e9, scores)
    A = jax.nn.softmax(scores, axis=-1)
    out = jnp.einsum("bhqk,bhkd->bhqd", A, V).transpose(0, 2, 1, 3).reshape(B, Sq, D)
    return out @ wo


def _ref_decoder_block(x, enc, src_mask, tgt_mask, p, n_heads, eps=1e-6):
    xn = _ref_layernorm(x, p["ln1_alpha"], p["ln1_beta"], eps)
    x = x + _ref_mha(xn, xn, xn, tgt_mask,
                     p["self_wq"], p["self_wk"], p["self_wv"], p["self_wo"], n_heads)
    xn = _ref_layernorm(x, p["ln2_alpha"], p["ln2_beta"], eps)
    x = x + _ref_mha(xn, enc, enc, src_mask,
                     p["cross_wq"], p["cross_wk"], p["cross_wv"], p["cross_wo"], n_heads)
    xn = _ref_layernorm(x, p["ln3_alpha"], p["ln3_beta"], eps)
    h = jnp.maximum(xn @ p["ffn_w1"] + p["ffn_b1"], 0.0)
    return x + h @ p["ffn_w2"] + p["ffn_b2"]


if __name__ == "__main__":
    B, S, S_ENC, D, H, D_FF = 2, 8, 8, 32, 4, 64

    key = jax.random.PRNGKey(0)
    ks = jax.random.split(key, 24)

    def lin(k, fan_in, shape):
        return jax.random.normal(k, shape, jnp.float32) / jnp.sqrt(fan_in)

    params = {
        "ln1_alpha": 1.0 + 0.1 * jax.random.normal(ks[0], (D,), jnp.float32),
        "ln1_beta": 0.1 * jax.random.normal(ks[1], (D,), jnp.float32),
        "ln2_alpha": 1.0 + 0.1 * jax.random.normal(ks[2], (D,), jnp.float32),
        "ln2_beta": 0.1 * jax.random.normal(ks[3], (D,), jnp.float32),
        "ln3_alpha": 1.0 + 0.1 * jax.random.normal(ks[4], (D,), jnp.float32),
        "ln3_beta": 0.1 * jax.random.normal(ks[5], (D,), jnp.float32),
        "self_wq": lin(ks[6], D, (D, D)),
        "self_wk": lin(ks[7], D, (D, D)),
        "self_wv": lin(ks[8], D, (D, D)),
        "self_wo": lin(ks[9], D, (D, D)),
        "cross_wq": lin(ks[10], D, (D, D)),
        "cross_wk": lin(ks[11], D, (D, D)),
        "cross_wv": lin(ks[12], D, (D, D)),
        "cross_wo": lin(ks[13], D, (D, D)),
        "ffn_w1": lin(ks[14], D, (D, D_FF)),
        "ffn_b1": 0.1 * jax.random.normal(ks[15], (D_FF,), jnp.float32),
        "ffn_w2": lin(ks[16], D_FF, (D_FF, D)),
        "ffn_b2": 0.1 * jax.random.normal(ks[17], (D,), jnp.float32),
    }

    x = jax.random.normal(ks[18], (B, S, D), jnp.float32)
    enc = jax.random.normal(ks[19], (B, S_ENC, D), jnp.float32)
    tgt_mask = jnp.broadcast_to(jnp.tril(jnp.ones((S, S), jnp.int32)), (B, S, S))
    src_mask = jnp.ones((B, S, S_ENC), jnp.int32)

    out = decoder_block_forward(x, enc, src_mask, tgt_mask, params, n_heads=H)
    out = jax.block_until_ready(out)

    ref = _ref_decoder_block(x, enc, src_mask, tgt_mask, params, H)
    assert out.shape == (B, S, D)
    max_err = float(jnp.max(jnp.abs(out - ref)))
    # bf16 MXU operands -> loose-ish tolerance vs the f32 reference.
    assert jnp.allclose(out, ref, atol=5e-2, rtol=5e-2), (
        f"mismatch vs reference, max abs err={max_err}")

    print("KERNEL_OK")
</pallas_src>

<mosaic_0001>
module attributes {stable_mosaic.version = 11 : i64} {
  func.func @kernel(%arg0: i32, %arg1: i32, %arg2: memref<16x32xf32, #tpu.memory_space<vmem>>, %arg3: memref<1x32xf32, #tpu.memory_space<vmem>>, %arg4: memref<1x32xf32, #tpu.memory_space<vmem>>, %arg5: memref<32x96xbf16, #tpu.memory_space<vmem>>, %arg6: memref<1x96xf32, #tpu.memory_space<vmem>>, %arg7: memref<16x96xbf16, #tpu.memory_space<vmem>>) attributes {dimension_semantics = [#tpu.dimension_semantics<parallel>, #tpu.dimension_semantics<parallel>], iteration_bounds = array<i64: 1, 1>, scalar_prefetch = 0 : i64, scratch_operands = 0 : i64, tpu.core_type = #tpu.core_type<tc>, window_params = [{transform_indices = @transform_0, window_bounds = array<i64: 16, 32>}, {pipeline_mode = #tpu.pipeline_mode<synchronous>, transform_indices = @transform_1, window_bounds = array<i64: 1, 32>}, {pipeline_mode = #tpu.pipeline_mode<synchronous>, transform_indices = @transform_2, window_bounds = array<i64: 1, 32>}, {transform_indices = @transform_3, window_bounds = array<i64: 32, 96>}, {transform_indices = @transform_4, window_bounds = array<i64: 1, 96>}, {transform_indices = @transform_5, window_bounds = array<i64: 16, 96>}]} {
    %c0 = arith.constant 0 : index
    %c0_0 = arith.constant 0 : index
    %0 = vector.load %arg2[%c0, %c0_0] : memref<16x32xf32, #tpu.memory_space<vmem>>, vector<16x32xf32>
    %cst = arith.constant dense<0.000000e+00> : vector<16xf32>
    %1 = vector.multi_reduction <add>, %0, %cst [1] : vector<16x32xf32> to vector<16xf32>
    %2 = vector.shape_cast %1 : vector<16xf32> to vector<16x1xf32>
    %cst_1 = arith.constant 3.200000e+01 : f32
    %3 = vector.broadcast %cst_1 : f32 to vector<16x1xf32>
    %4 = arith.divf %2, %3 : vector<16x1xf32>
    %5 = vector.broadcast %4 : vector<16x1xf32> to vector<16x32xf32>
    %6 = arith.subf %0, %5 : vector<16x32xf32>
    %7 = arith.mulf %6, %6 : vector<16x32xf32>
    %cst_2 = arith.constant dense<0.000000e+00> : vector<16xf32>
    %8 = vector.multi_reduction <add>, %7, %cst_2 [1] : vector<16x32xf32> to vector<16xf32>
    %9 = vector.shape_cast %8 : vector<16xf32> to vector<16x1xf32>
    %cst_3 = arith.constant 0.0322580636 : f32
    %10 = vector.broadcast %cst_3 : f32 to vector<16x1xf32>
    %11 = arith.mulf %9, %10 : vector<16x1xf32>
    %12 = math.sqrt %11 : vector<16x1xf32>
    %cst_4 = arith.constant 9.99999997E-7 : f32
    %13 = vector.broadcast %cst_4 : f32 to vector<16x1xf32>
    %14 = arith.addf %12, %13 : vector<16x1xf32>
    %15 = tpu.reciprocal %14 {approx = true} : vector<16x1xf32> -> vector<16x1xf32>
    %c0_5 = arith.constant 0 : index
    %c0_6 = arith.constant 0 : index
    %16 = vector.load %arg3[%c0_5, %c0_6] : memref<1x32xf32, #tpu.memory_space<vmem>>, vector<1x32xf32>
    %17 = vector.broadcast %15 : vector<16x1xf32> to vector<16x32xf32>
    %18 = arith.mulf %6, %17 : vector<16x32xf32>
    %19 = vector.broadcast %16 : vector<1x32xf32> to vector<16x32xf32>
    %20 = arith.mulf %19, %18 : vector<16x32xf32>
    %c0_7 = arith.constant 0 : index
    %c0_8 = arith.constant 0 : index
    %21 = vector.load %arg4[%c0_7, %c0_8] : memref<1x32xf32, #tpu.memory_space<vmem>>, vector<1x32xf32>
    %22 = vector.broadcast %21 : vector<1x32xf32> to vector<16x32xf32>
    %23 = arith.addf %20, %22 : vector<16x32xf32>
    %24 = arith.truncf %23 : vector<16x32xf32> to vector<16x32xbf16>
    %c0_9 = arith.constant 0 : index
    %c0_10 = arith.constant 0 : index
    %25 = vector.load %arg5[%c0_9, %c0_10] : memref<32x96xbf16, #tpu.memory_space<vmem>>, vector<32x96xbf16>
    %cst_11 = arith.constant dense<0.000000e+00> : vector<16x96xf32>
    %26 = tpu.matmul %24, %25, %cst_11 {dimension_numbers = #tpu.dot_dimension_numbers<[1], [0], [0], [1], [0, 0, 1, 1], [], []>} : vector<16x32xbf16>, vector<32x96xbf16>, vector<16x96xf32> -> vector<16x96xf32>
    %c0_12 = arith.constant 0 : index
    %c0_13 = arith.constant 0 : index
    %27 = vector.load %arg6[%c0_12, %c0_13] : memref<1x96xf32, #tpu.memory_space<vmem>>, vector<1x96xf32>
    %28 = vector.broadcast %27 : vector<1x96xf32> to vector<16x96xf32>
    %29 = arith.addf %26, %28 : vector<16x96xf32>
    %30 = arith.truncf %29 : vector<16x96xf32> to vector<16x96xbf16>
    %c0_14 = arith.constant 0 : index
    %c0_15 = arith.constant 0 : index
    %31 = vector.load %arg7[%c0_14, %c0_15] : memref<16x96xbf16, #tpu.memory_space<vmem>>, vector<16x96xbf16>
    tpu.vector_store %arg7[%c0_14, %c0_15], %30 {strides = array<i32>} : memref<16x96xbf16, #tpu.memory_space<vmem>>, vector<16x96xbf16>,
    return
  }
  func.func @transform_0(%arg0: i32, %arg1: i32) -> (i32, i32) {
    %c0_i32 = arith.constant 0 : i32
    %c0_i32_0 = arith.constant 0 : i32
    return %arg0, %c0_i32 : i32, i32
  }
  func.func @transform_1(%arg0: i32, %arg1: i32) -> (i32, i32) {
    %c0_i32 = arith.constant 0 : i32
    %c0_i32_0 = arith.constant 0 : i32
    %c0_i32_1 = arith.constant 0 : i32
    return %c0_i32, %c0_i32_0 : i32, i32
  }
  func.func @transform_2(%arg0: i32, %arg1: i32) -> (i32, i32) {
    %c0_i32 = arith.constant 0 : i32
    %c0_i32_0 = arith.constant 0 : i32
    %c0_i32_1 = arith.constant 0 : i32
    return %c0_i32, %c0_i32_0 : i32, i32
  }
  func.func @transform_3(%arg0: i32, %arg1: i32) -> (i32, i32) {
    %c0_i32 = arith.constant 0 : i32
    %c0_i32_0 = arith.constant 0 : i32
    return %c0_i32, %arg1 : i32, i32
  }
  func.func @transform_4(%arg0: i32, %arg1: i32) -> (i32, i32) {
    %c0_i32 = arith.constant 0 : i32
    %c0_i32_0 = arith.constant 0 : i32
    return %c0_i32, %arg1 : i32, i32
  }
  func.func @transform_5(%arg0: i32, %arg1: i32) -> (i32, i32) {
    %c0_i32 = arith.constant 0 : i32
    return %arg0, %arg1 : i32, i32
  }
}

</mosaic_0001>

<bundles_post_ra>
// kernel: tpu_custom_call.1
= control target key start
LH: loop header
LB: loop body
LE: loop exit
PB: predicated region body
PF: predicated region fallthrough
CT: control target
= control target key end

     0   :  { %10 = vsyncpa [#allocation3], 0  ;;  %s416_s0 = inlined_call_operand.hbm [shape: f32[16,32], index: 0, kind: input, shape index: {}]   ;;  %s417_s1 = inlined_call_operand.vmem [shape: f32[1,32], index: 1, kind: input, shape index: {}]   ;;  %s418_s2 = inlined_call_operand.vmem [shape: f32[1,32], index: 2, kind: input, shape index: {}]   ;;  %s419_s3 = inlined_call_operand.hbm [shape: bf16[32,96], index: 3, kind: input, shape index: {}]   ;;  %s420_s4 = inlined_call_operand.vmem [shape: f32[1,96], index: 4, kind: input, shape index: {}]   ;;  %s421_s5 = inlined_call_operand.hbm [shape: bf16[16,96], index: 5, kind: output, shape index: {}]  }
   0x1   :  { %11 = vsyncpa [#allocation6], 0 }
   0x2   :  { %12 = vsyncpa [#allocation4], 0  ;;  %s321_s18 = smov [#allocation2]   ;;  %s249_s22 = scalar_lea.hbm %s416_s0, 256 }
   0x3   :  { %s18_s19 = sshll.u32 %s321_s18, 4  ;;  %p250_p0 = scmp.ne.s32.totalorder %s416_s0, %s249_s22  ;;  %s19_s19 = int_to_ptr.vmem [resolvable:$true] %s18_s19 }
   0x4   :  { %p253_p1 = scmp.lt.u32.totalorder %s249_s22, %s416_s0 }
   0x6   :  { %p255_p2 = pnand %p253_p1, %p250_p0 }
   0x8   :  { %258 = shalt.err (!%p255_p2)
}
   0x9   :  { %s259_s27 = scalar_lea.vmem %s19_s19, 256  ;;  %p264_p4 = scmp.lt.s32.totalorder %s19_s19, %s19_s19 }
   0xa   :  { %p260_p3 = scmp.ne.s32.totalorder %s19_s19, %s259_s27  ;;  %p265_p5 = scmp.lt.s32.totalorder %s259_s27, %s259_s27 }
   0xc   :  { %p266_p6 = por %p265_p5, %p264_p4 }
   0xe   :  { %p267_p7 = pnand %p266_p6, %p260_p3 }
  0x10   :  { %270 = shalt.err (!%p267_p7)
}
  0x11   :  { %s322_s28 = smov 128   ;;  %s323_s29 = smov 8  }
  0x12   :  { %24 = dma.hbm_to_vmem [thread:$0]  %s416_s0, 256, %s19_s19, [#allocation3], %s322_s28, %s322_s28, %s323_s29  }
  0x13   :  { %s324_s7 = smov [#allocation5]   ;;  %s271_s11 = scalar_lea.hbm %s419_s3, 256 }
  0x14   :  { %s34_s8 = sshll.u32 %s324_s7, 4  ;;  %p272_p8 = scmp.ne.s32.totalorder %s419_s3, %s271_s11  ;;  %s35_s8 = int_to_ptr.vmem [resolvable:$true] %s34_s8 }
  0x15   :  { %p275_p9 = scmp.lt.u32.totalorder %s271_s11, %s419_s3 }
  0x17   :  { %p277_p10 = pnand %p275_p9, %p272_p8 }
  0x19   :  { %280 = shalt.err (!%p277_p10)
}
  0x1a   :  { %s281_s16 = scalar_lea.vmem %s35_s8, 256  ;;  %p286_p12 = scmp.lt.s32.totalorder %s35_s8, %s35_s8 }
  0x1b   :  { %p282_p11 = scmp.ne.s32.totalorder %s35_s8, %s281_s16  ;;  %p287_p13 = scmp.lt.s32.totalorder %s281_s16, %s281_s16 }
  0x1d   :  { %p288_p0 = por %p287_p13, %p286_p12 }
  0x1f   :  { %p289_p1 = pnand %p288_p0, %p282_p11 }
  0x21   :  { %292 = shalt.err (!%p289_p1)
}
  0x22   :  { %s325_s0 = smov 64   ;;  %s326_s17 = smov 4  }
  0x23   :  { %40 = dma.hbm_to_vmem [thread:$0]  %s419_s3, 256, %s35_s8, [#allocation6], %s325_s0, %s325_s0, %s326_s17  }
  0x24   :  { %315 = dma.done.wait [#allocation3], 256  }
  0x25   :  { %316 = vsyncadd [#allocation3], 4294967040 }
  0x26   :  { %317 = dma.done.wait [#allocation6], 256  }
  0x27   :  { %318 = vsyncadd [#allocation6], 4294967040  ;;  %vm52_vm0 = vcmask 261120   ;;  %v50_v0 = vld [vmem:[#allocation2] sm:$0xff]  ;;  %v51_v1 = vld [vmem:[#allocation2 + $0x8] sm:$0xff]  ;;  %v327_v15 = vmov 0.0  }
  0x28   :  { %v53_v2 = vsel %vm52_vm0, %v50_v0, 0.0  ;;  %v56_v3 = vsel %vm52_vm0, %v51_v1, 0.0  ;;  %v239_v14 = vld [vmem:[#allocation5] sm:$0xff]   ;;  %222 = vmatprep.subr.bf16.mxu0 %v327_v15  ;;  %vm328_vm1 = vmmov 0   ;;  %v240_v16 = vld [vmem:[#allocation5 + $0x8] sm:$0xff]   ;;  %vm188_vm6 = vcmask 781312  }
  0x29   :  { %54 = vadd.xlane.f32.xlu0 %v53_v2  ;;  %226 = vmatprep.mubr.msk.bf16.mxu0 %vm328_vm1, %v327_v15  ;;  %v209_v35 = vld [vmem:[%s417_s1] ss:$0 sm:$0xff]  ;;  %s329_s1 = smov [#allocation7]  }
  0x2a   :  { %223 = vmatpush3.bf16.msra.mxu0 %v239_v14  ;;  %v210_v39 = vld [vmem:[%s418_s2] ss:$0 sm:$0xff]  ;;  %s196_s25 = sshll.u32 %s329_s1, 4  ;;  %s197_s25 = int_to_ptr.vmem [resolvable:$true] %s196_s25 }
  0x2b   :  { %224 = vmatprep.subr.bf16.mxu0 %v327_v15  ;;  %v211_v44 = vld [vmem:[%s420_s4] ss:$0 sm:$0xff]  ;;  %s293_s2 = scalar_lea.vmem %s197_s25, 128  ;;  %p298_p3 = scmp.lt.s32.totalorder %s197_s25, %s197_s25 }
  0x2c   :  { %p294_p2 = scmp.ne.s32.totalorder %s197_s25, %s293_s2  ;;  %p299_p4 = scmp.lt.s32.totalorder %s293_s2, %s293_s2 }
  0x2d   :  { %57 = vadd.xlane.f32.xlu0 %v56_v3 }
  0x2e   :  { %225 = vmatpush3.bf16.msra.mxu0 %v240_v16  ;;  %p300_p5 = por %p299_p4, %p298_p3 }
  0x30   :  { %p301_p6 = pnand %p300_p5, %p294_p2 }
  0xb6   :  { %v55_v4 = vpop.xlane.xlu0 %54 }
  0xb7   :  { %v60_v5 = vmul.f32 0.03125, %v55_v4 }
  0xb9   :  { %v62_v6 = vsub.f32 %v50_v0, %v60_v5 }
  0xba   :  { %v58_v7 = vpop.xlane.xlu0 %57 }
  0xbb   :  { %v61_v8 = vmul.f32 0.03125, %v58_v7  ;;  %v64_v9 = vmul.f32 %v62_v6, %v62_v6 }
  0xbd   :  { %v63_v10 = vsub.f32 %v51_v1, %v61_v8  ;;  %v66_v11 = vsel %vm52_vm0, %v64_v9, 0.0 }
  0xbe   :  { %67 = vadd.xlane.f32.xlu1 %v66_v11 }
  0xbf   :  { %v65_v12 = vmul.f32 %v63_v10, %v63_v10 }
  0xc1   :  { %v69_v13 = vsel %vm52_vm0, %v65_v12, 0.0 }
  0xc2   :  { %70 = vadd.xlane.f32.xlu1 %v69_v13 }
 0x14b   :  { %v68_v17 = vpop.xlane.xlu1 %67 }
 0x14c   :  { %v72_v18 = vmul.f32 0.032258064, %v68_v17 }
 0x14e   :  { %241 = vrsqrt.f32 %v72_v18  ;;  %vm76_vm2 = vcmp.eq.f32.partialorder %v72_v18, inf  ;;  %v79_v23 = vand.u32 2147483648, %v72_v18  ;;  %vm78_vm3 = vcmp.eq.f32.partialorder %v72_v18, 0.0 }
 0x14f   :  { %v71_v19 = vpop.xlane.xlu1 %70 }
 0x150   :  { %v73_v20 = vmul.f32 0.032258064, %v71_v19 }
 0x152   :  { %243 = vrsqrt.f32 %v73_v20  ;;  %vm83_vm4 = vcmp.eq.f32.partialorder %v73_v20, inf  ;;  %v86_v29 = vand.u32 2147483648, %v73_v20  ;;  %vm85_vm5 = vcmp.eq.f32.partialorder %v73_v20, 0.0 }
 0x158   :  { %v242_v21 = vpop.eup %241 }
 0x159   :  { %v75_v22 = vmul.f32 %v242_v21, %v72_v18 }
 0x15b   :  { %v77_v24 = vsel %vm76_vm2, %v72_v18, %v75_v22 }
 0x15c   :  { %v244_v25 = vpop.eup %243  ;;  %v80_v26 = vsel %vm78_vm3, %v79_v23, %v77_v24 }
 0x15d   :  { %v88_v27 = vadd.f32 1e-06, %v80_v26  ;;  %v82_v28 = vmul.f32 %v244_v25, %v73_v20 }
 0x15f   :  { %245 = vrcp.f32 %v88_v27  ;;  %v84_v30 = vsel %vm83_vm4, %v73_v20, %v82_v28 }
 0x160   :  { %v87_v31 = vsel %vm85_vm5, %v86_v29, %v84_v30 }
 0x161   :  { %v89_v32 = vadd.f32 1e-06, %v87_v31 }
 0x163   :  { %247 = vrcp.f32 %v89_v32 }
 0x169   :  { %v246_v33 = vpop.eup %245 }
 0x16a   :  { %v93_v34 = vmul.f32 %v246_v33, %v62_v6 }
 0x16c   :  { %v101_v38 = vmul.f32 %v209_v35, %v93_v34 }
 0x16d   :  { %v248_v36 = vpop.eup %247 }
 0x16e   :  { %v94_v37 = vmul.f32 %v248_v36, %v63_v10  ;;  %v110_v41 = vadd.f32 %v210_v39, %v101_v38 }
 0x170   :  { %v102_v40 = vmul.f32 %v209_v35, %v94_v37 }
 0x172   :  { %v111_v42 = vadd.f32 %v210_v39, %v102_v40 }
 0x174   :  { %v112_v43 = vpack.c.bf16 %v111_v42, %v110_v41 }
 0x176   :  { %227 = vmatmul.mubr.msk.bf16.vlgmr.msra.gmra.mrb[0].mxu0 %vm52_vm0, %v112_v43 }
 0x249   :  { %v173_v45 = vpop.f32.mrb[0].mxu0 }
 0x24a   :  { %v174_v46 = vadd.f32 %v211_v44, %v173_v45  ;;  %v228_v47 = vpop.f32.mrb[1].mxu0 }
 0x24b   :  { %v176_v48 = vpop.f32.mrb[2].mxu0 }
 0x24c   :  { %v217_v49 = vpack.c.bf16 %v174_v46, %v174_v46  ;;  %v177_v50 = vadd.f32 %v211_v44, %v176_v48  ;;  %v229_v51 = vpop.f32.mrb[3].mxu0 }
 0x24e   :  { %v218_v52 = vpack.c.bf16 %v177_v50, %v177_v50  ;;  %189 = vst.msk [vmem:[#allocation7] sm:$0xf] %vm188_vm6, %v217_v49 }
 0x250   :  { %190 = vst.msk [vmem:[#allocation7 + $0x4] sm:$0xf] %vm188_vm6, %v218_v52 }
 0x251   :  { %304 = shalt.err (!%p301_p6)
}
 0x252   :  { %s305_s27 = scalar_lea.hbm %s421_s5, 128 }
 0x253   :  { %p306_p7 = scmp.ne.s32.totalorder %s421_s5, %s305_s27  ;;  %p309_p8 = scmp.lt.u32.totalorder %s305_s27, %s421_s5 }
 0x255   :  { %p311_p9 = pnand %p309_p8, %p306_p7 }
 0x257   :  { %314 = shalt.err (!%p311_p9)
}
 0x258   :  { %202 = dma.vmem_to_hbm [thread:$0]  %s197_s25, 128, %s421_s5, [#allocation4], %s325_s0, %s325_s0, %s326_s17  }
 0x259   :  { %319 = dma.done.wait [#allocation4], 128  }
 0x25a   :  { %320 = vsyncadd [#allocation4], 4294967168 }
 0x25b   :  { %206 = vsyncpa [#allocation3], 1 }
 0x25c   :  { %207 = vsyncpa [#allocation6], 1 }
 0x25d   :  { %208 = vsyncpa [#allocation4], 1 }

</bundles_post_ra>
